<compile_context>
chip_gen: v6e
topology: v6e:2x2x1
jax: 0.10.0
libtpu: 0.0.40
codegen_flags: <defaults>
</compile_context>

<pallas_src>
import jax
import jax.numpy as jnp
from jax.experimental import pallas as pl
from jax.experimental.pallas import tpu as pltpu

LANE = 128
SUBLANE = 8


def _round_up(n, m):
    return ((n + m - 1) // m) * m


def _cdiv(a, b):
    return -(-a // b)


def binary_ann_kernel(x_ref, w1_ref, b1_ref, w2_ref, b2_ref, w3_ref, b3_ref, o_ref):
    # fc1 + ReLU  (bf16 MXU operands, f32 accumulate / bias / ReLU on the VPU)
    h1 = jnp.dot(x_ref[...], w1_ref[...], preferred_element_type=jnp.float32)
    h1 = jnp.maximum(h1 + b1_ref[...], 0.0)
    # fc2 + ReLU
    h2 = jnp.dot(h1.astype(w2_ref.dtype), w2_ref[...], preferred_element_type=jnp.float32)
    h2 = jnp.maximum(h2 + b2_ref[...], 0.0)
    # fc3 logits (narrow N; MXU pads internally, only n_out columns are stored)
    out = jnp.dot(h2.astype(w3_ref.dtype), w3_ref[...], preferred_element_type=jnp.float32)
    o_ref[...] = (out + b3_ref[...]).astype(o_ref.dtype)


def binary_ann_forward(x, w1, b1, w2, b2, w3, b3, *, target_tm=4096,
                       compute_dtype=jnp.bfloat16):
    """x: (B, in).  w*: (in, out) (transposed from PyTorch).  b*: (out,) or (1, out)."""
    B, in_f = x.shape
    hid = w1.shape[1]
    n_out = w3.shape[1]

    # Only the hidden axis is padded to 128 lanes (it is both an MXU K/N dim and the lane
    # axis of the resident weights).  Input features and logit columns stay at their true
    # widths: a block whose last dim equals the full array dim is legal below 128.
    hid_p = _round_up(hid, LANE)

    # Batch tile derived from B so padding waste is bounded; keep >=2 grid steps when the
    # batch allows it so the "parallel" axis can be sharded over v7x's 2 TensorCores.
    B_s = _round_up(max(B, 1), SUBLANE)
    n_steps = max(1, _cdiv(B_s, target_tm))
    if B_s >= 2 * SUBLANE:
        n_steps = max(n_steps, 2)
    tm = _round_up(_cdiv(B_s, n_steps), SUBLANE)
    B_p = _round_up(B_s, tm)

    def pad2(a, rows, cols, dtype):
        a = a.reshape((1, -1)) if a.ndim == 1 else a
        out = jnp.zeros((rows, cols), dtype)
        return out.at[: a.shape[0], : a.shape[1]].set(a.astype(dtype))

    xp = pad2(x, B_p, in_f, compute_dtype)       # (B_p, in_f)  -- no lane padding on x
    w1p = pad2(w1, in_f, hid_p, compute_dtype)
    w2p = pad2(w2, hid_p, hid_p, compute_dtype)
    w3p = pad2(w3, hid_p, n_out, compute_dtype)  # narrow N stays unpadded
    b1p = pad2(b1, 1, hid_p, jnp.float32)
    b2p = pad2(b2, 1, hid_p, jnp.float32)
    b3p = pad2(b3, 1, n_out, jnp.float32)

    grid = (B_p // tm,)

    itemsize = jnp.dtype(compute_dtype).itemsize
    flops = 2 * B_p * (in_f * hid_p + hid_p * hid_p + hid_p * n_out)
    bytes_accessed = (
        B_p * in_f * itemsize                                        # streamed x (unpadded)
        + (in_f * hid_p + hid_p * hid_p + hid_p * n_out) * itemsize  # resident weights
        + (2 * hid_p + n_out) * 4                                    # biases (f32)
        + B_p * n_out * 4                                            # narrow logits writeback
    )

    def run(use_buffered):
        def resident(shape):
            # Same block every grid step -> DMA'd once, stays resident in VMEM.
            if use_buffered:
                return pl.BlockSpec(shape, lambda i: (0, 0),
                                    pipeline_mode=pl.Buffered(1))
            return pl.BlockSpec(shape, lambda i: (0, 0))

        return pl.pallas_call(
            binary_ann_kernel,
            out_shape=jax.ShapeDtypeStruct((B_p, n_out), jnp.float32),
            grid=grid,
            in_specs=[
                pl.BlockSpec((tm, in_f), lambda i: (i, 0)),
                resident(w1p.shape), resident(b1p.shape),
                resident(w2p.shape), resident(b2p.shape),
                resident(w3p.shape), resident(b3p.shape),
            ],
            out_specs=pl.BlockSpec((tm, n_out), lambda i: (i, 0)),
            compiler_params=pltpu.CompilerParams(
                dimension_semantics=("parallel",),
                vmem_limit_bytes=32 * 1024 * 1024,
            ),
            cost_estimate=pl.CostEstimate(
                flops=flops, transcendentals=0, bytes_accessed=bytes_accessed
            ),
        )(xp, w1p, b1p, w2p, b2p, w3p, b3p)

    try:
        out_padded = run(True)
    except Exception:
        # pipeline_mode=Buffered(1) is a pure VMEM/bookkeeping micro-opt; fall back to
        # default double-buffering if this jax/Mosaic version rejects it.
        out_padded = run(False)

    return out_padded[:B]


def init_linear_params(key, in_features, out_features):
    # Mimic torch.nn.Linear default init: U(-1/sqrt(in), 1/sqrt(in)); deterministic.
    kw, kb = jax.random.split(key)
    bound = 1.0 / jnp.sqrt(jnp.float32(in_features))
    # Stored already transposed: (in_features, out_features)
    w = jax.random.uniform(kw, (in_features, out_features), jnp.float32, -bound, bound)
    b = jax.random.uniform(kb, (1, out_features), jnp.float32, -bound, bound)
    return w, b


if __name__ == "__main__":
    input_size = 32
    hidden_size = 128   # module default
    batch = 8

    key = jax.random.PRNGKey(0)
    kx, k1, k2, k3 = jax.random.split(key, 4)

    x = jax.random.normal(kx, (batch, input_size), jnp.float32)
    w1, b1 = init_linear_params(k1, input_size, hidden_size)
    w2, b2 = init_linear_params(k2, hidden_size, hidden_size)
    w3, b3 = init_linear_params(k3, hidden_size, 2)

    out = binary_ann_forward(x, w1, b1, w2, b2, w3, b3)
    out = jax.block_until_ready(out)

    # Pure-JAX f32 reference (kernel uses bf16 MXU operands -> loose tolerance).
    ref = jnp.maximum(x @ w1 + b1, 0.0)
    ref = jnp.maximum(ref @ w2 + b2, 0.0)
    ref = ref @ w3 + b3
    assert out.shape == (batch, 2), f"bad shape {out.shape}"
    assert jnp.allclose(out, ref, atol=5e-2, rtol=5e-2), (
        f"max abs err {jnp.max(jnp.abs(out - ref))}"
    )

    print("KERNEL_OK")
</pallas_src>

<mosaic_0001>
module attributes {stable_mosaic.version = 11 : i64} {
  func.func @binary_ann_kernel(%arg0: i32, %arg1: memref<8x32xbf16, #tpu.memory_space<vmem>>, %arg2: memref<32x128xbf16, #tpu.memory_space<vmem>>, %arg3: memref<1x128xf32, #tpu.memory_space<vmem>>, %arg4: memref<128x128xbf16, #tpu.memory_space<vmem>>, %arg5: memref<1x128xf32, #tpu.memory_space<vmem>>, %arg6: memref<128x2xbf16, #tpu.memory_space<vmem>>, %arg7: memref<1x2xf32, #tpu.memory_space<vmem>>, %arg8: memref<8x2xf32, #tpu.memory_space<vmem>>) attributes {dimension_semantics = [#tpu.dimension_semantics<parallel>], iteration_bounds = array<i64: 1>, scalar_prefetch = 0 : i64, scratch_operands = 0 : i64, tpu.core_type = #tpu.core_type<tc>, window_params = [{transform_indices = @transform_0, window_bounds = array<i64: 8, 32>}, {pipeline_mode = #tpu.pipeline_mode<synchronous>, transform_indices = @transform_1, window_bounds = array<i64: 32, 128>}, {pipeline_mode = #tpu.pipeline_mode<synchronous>, transform_indices = @transform_2, window_bounds = array<i64: 1, 128>}, {pipeline_mode = #tpu.pipeline_mode<synchronous>, transform_indices = @transform_3, window_bounds = array<i64: 128, 128>}, {pipeline_mode = #tpu.pipeline_mode<synchronous>, transform_indices = @transform_4, window_bounds = array<i64: 1, 128>}, {pipeline_mode = #tpu.pipeline_mode<synchronous>, transform_indices = @transform_5, window_bounds = array<i64: 128, 2>}, {pipeline_mode = #tpu.pipeline_mode<synchronous>, transform_indices = @transform_6, window_bounds = array<i64: 1, 2>}, {transform_indices = @transform_7, window_bounds = array<i64: 8, 2>}]} {
    %c0 = arith.constant 0 : index
    %c0_0 = arith.constant 0 : index
    %0 = vector.load %arg1[%c0, %c0_0] : memref<8x32xbf16, #tpu.memory_space<vmem>>, vector<8x32xbf16>
    %c0_1 = arith.constant 0 : index
    %c0_2 = arith.constant 0 : index
    %1 = vector.load %arg2[%c0_1, %c0_2] : memref<32x128xbf16, #tpu.memory_space<vmem>>, vector<32x128xbf16>
    %cst = arith.constant dense<0.000000e+00> : vector<8x128xf32>
    %2 = tpu.matmul %0, %1, %cst {dimension_numbers = #tpu.dot_dimension_numbers<[1], [0], [0], [1], [0, 0, 1, 1], [], []>} : vector<8x32xbf16>, vector<32x128xbf16>, vector<8x128xf32> -> vector<8x128xf32>
    %c0_3 = arith.constant 0 : index
    %c0_4 = arith.constant 0 : index
    %3 = vector.load %arg3[%c0_3, %c0_4] : memref<1x128xf32, #tpu.memory_space<vmem>>, vector<1x128xf32>
    %4 = vector.broadcast %3 : vector<1x128xf32> to vector<8x128xf32>
    %5 = arith.addf %2, %4 : vector<8x128xf32>
    %cst_5 = arith.constant 0.000000e+00 : f32
    %6 = vector.broadcast %cst_5 : f32 to vector<8x128xf32>
    %7 = arith.maximumf %5, %6 : vector<8x128xf32>
    %8 = arith.truncf %7 : vector<8x128xf32> to vector<8x128xbf16>
    %c0_6 = arith.constant 0 : index
    %c0_7 = arith.constant 0 : index
    %9 = vector.load %arg4[%c0_6, %c0_7] : memref<128x128xbf16, #tpu.memory_space<vmem>>, vector<128x128xbf16>
    %cst_8 = arith.constant dense<0.000000e+00> : vector<8x128xf32>
    %10 = tpu.matmul %8, %9, %cst_8 {dimension_numbers = #tpu.dot_dimension_numbers<[1], [0], [0], [1], [0, 0, 1, 1], [], []>} : vector<8x128xbf16>, vector<128x128xbf16>, vector<8x128xf32> -> vector<8x128xf32>
    %c0_9 = arith.constant 0 : index
    %c0_10 = arith.constant 0 : index
    %11 = vector.load %arg5[%c0_9, %c0_10] : memref<1x128xf32, #tpu.memory_space<vmem>>, vector<1x128xf32>
    %12 = vector.broadcast %11 : vector<1x128xf32> to vector<8x128xf32>
    %13 = arith.addf %10, %12 : vector<8x128xf32>
    %cst_11 = arith.constant 0.000000e+00 : f32
    %14 = vector.broadcast %cst_11 : f32 to vector<8x128xf32>
    %15 = arith.maximumf %13, %14 : vector<8x128xf32>
    %16 = arith.truncf %15 : vector<8x128xf32> to vector<8x128xbf16>
    %c0_12 = arith.constant 0 : index
    %c0_13 = arith.constant 0 : index
    %17 = vector.load %arg6[%c0_12, %c0_13] : memref<128x2xbf16, #tpu.memory_space<vmem>>, vector<128x2xbf16>
    %cst_14 = arith.constant dense<0.000000e+00> : vector<8x2xf32>
    %18 = tpu.matmul %16, %17, %cst_14 {dimension_numbers = #tpu.dot_dimension_numbers<[1], [0], [0], [1], [0, 0, 1, 1], [], []>} : vector<8x128xbf16>, vector<128x2xbf16>, vector<8x2xf32> -> vector<8x2xf32>
    %c0_15 = arith.constant 0 : index
    %c0_16 = arith.constant 0 : index
    %19 = vector.load %arg7[%c0_15, %c0_16] : memref<1x2xf32, #tpu.memory_space<vmem>>, vector<1x2xf32>
    %20 = vector.broadcast %19 : vector<1x2xf32> to vector<8x2xf32>
    %21 = arith.addf %18, %20 : vector<8x2xf32>
    %c0_17 = arith.constant 0 : index
    %c0_18 = arith.constant 0 : index
    %22 = vector.load %arg8[%c0_17, %c0_18] : memref<8x2xf32, #tpu.memory_space<vmem>>, vector<8x2xf32>
    tpu.vector_store %arg8[%c0_17, %c0_18], %21 {strides = array<i32>} : memref<8x2xf32, #tpu.memory_space<vmem>>, vector<8x2xf32>,
    return
  }
  func.func @transform_0(%arg0: i32) -> (i32, i32) {
    %c0_i32 = arith.constant 0 : i32
    %c0_i32_0 = arith.constant 0 : i32
    return %arg0, %c0_i32 : i32, i32
  }
  func.func @transform_1(%arg0: i32) -> (i32, i32) {
    %c0_i32 = arith.constant 0 : i32
    %c0_i32_0 = arith.constant 0 : i32
    %c0_i32_1 = arith.constant 0 : i32
    return %c0_i32, %c0_i32_0 : i32, i32
  }
  func.func @transform_2(%arg0: i32) -> (i32, i32) {
    %c0_i32 = arith.constant 0 : i32
    %c0_i32_0 = arith.constant 0 : i32
    %c0_i32_1 = arith.constant 0 : i32
    return %c0_i32, %c0_i32_0 : i32, i32
  }
  func.func @transform_3(%arg0: i32) -> (i32, i32) {
    %c0_i32 = arith.constant 0 : i32
    %c0_i32_0 = arith.constant 0 : i32
    %c0_i32_1 = arith.constant 0 : i32
    return %c0_i32, %c0_i32_0 : i32, i32
  }
  func.func @transform_4(%arg0: i32) -> (i32, i32) {
    %c0_i32 = arith.constant 0 : i32
    %c0_i32_0 = arith.constant 0 : i32
    %c0_i32_1 = arith.constant 0 : i32
    return %c0_i32, %c0_i32_0 : i32, i32
  }
  func.func @transform_5(%arg0: i32) -> (i32, i32) {
    %c0_i32 = arith.constant 0 : i32
    %c0_i32_0 = arith.constant 0 : i32
    %c0_i32_1 = arith.constant 0 : i32
    return %c0_i32, %c0_i32_0 : i32, i32
  }
  func.func @transform_6(%arg0: i32) -> (i32, i32) {
    %c0_i32 = arith.constant 0 : i32
    %c0_i32_0 = arith.constant 0 : i32
    %c0_i32_1 = arith.constant 0 : i32
    return %c0_i32, %c0_i32_0 : i32, i32
  }
  func.func @transform_7(%arg0: i32) -> (i32, i32) {
    %c0_i32 = arith.constant 0 : i32
    %c0_i32_0 = arith.constant 0 : i32
    return %arg0, %c0_i32 : i32, i32
  }
}

module attributes {stable_mosaic.version = 11 : i64} {
  func.func @binary_ann_kernel(%arg0: i32, %arg1: memref<8x32xbf16, #tpu.memory_space<vmem>>, %arg2: memref<32x128xbf16, #tpu.memory_space<vmem>>, %arg3: memref<1x128xf32, #tpu.memory_space<vmem>>, %arg4: memref<128x128xbf16, #tpu.memory_space<vmem>>, %arg5: memref<1x128xf32, #tpu.memory_space<vmem>>, %arg6: memref<128x2xbf16, #tpu.memory_space<vmem>>, %arg7: memref<1x2xf32, #tpu.memory_space<vmem>>, %arg8: memref<8x2xf32, #tpu.memory_space<vmem>>) attributes {dimension_semantics = [#tpu.dimension_semantics<parallel>], iteration_bounds = array<i64: 1>, scalar_prefetch = 0 : i64, scratch_operands = 0 : i64, tpu.core_type = #tpu.core_type<tc>, window_params = [{transform_indices = @transform_0, window_bounds = array<i64: 8, 32>}, {pipeline_mode = #tpu.pipeline_mode<synchronous>, transform_indices = @transform_1, window_bounds = array<i64: 32, 128>}, {pipeline_mode = #tpu.pipeline_mode<synchronous>, transform_indices = @transform_2, window_bounds = array<i64: 1, 128>}, {pipeline_mode = #tpu.pipeline_mode<synchronous>, transform_indices = @transform_3, window_bounds = array<i64: 128, 128>}, {pipeline_mode = #tpu.pipeline_mode<synchronous>, transform_indices = @transform_4, window_bounds = array<i64: 1, 128>}, {pipeline_mode = #tpu.pipeline_mode<synchronous>, transform_indices = @transform_5, window_bounds = array<i64: 128, 2>}, {pipeline_mode = #tpu.pipeline_mode<synchronous>, transform_indices = @transform_6, window_bounds = array<i64: 1, 2>}, {transform_indices = @transform_7, window_bounds = array<i64: 8, 2>}]} {
    %c0 = arith.constant 0 : index
    %c0_0 = arith.constant 0 : index
    %0 = vector.load %arg1[%c0, %c0_0] : memref<8x32xbf16, #tpu.memory_space<vmem>>, vector<8x32xbf16>
    %c0_1 = arith.constant 0 : index
    %c0_2 = arith.constant 0 : index
    %1 = vector.load %arg2[%c0_1, %c0_2] : memref<32x128xbf16, #tpu.memory_space<vmem>>, vector<32x128xbf16>
    %cst = arith.constant dense<0.000000e+00> : vector<8x128xf32>
    %2 = tpu.matmul %0, %1, %cst {dimension_numbers = #tpu.dot_dimension_numbers<[1], [0], [0], [1], [0, 0, 1, 1], [], []>} : vector<8x32xbf16>, vector<32x128xbf16>, vector<8x128xf32> -> vector<8x128xf32>
    %c0_3 = arith.constant 0 : index
    %c0_4 = arith.constant 0 : index
    %3 = vector.load %arg3[%c0_3, %c0_4] : memref<1x128xf32, #tpu.memory_space<vmem>>, vector<1x128xf32>
    %4 = vector.broadcast %3 : vector<1x128xf32> to vector<8x128xf32>
    %5 = arith.addf %2, %4 : vector<8x128xf32>
    %cst_5 = arith.constant 0.000000e+00 : f32
    %6 = vector.broadcast %cst_5 : f32 to vector<8x128xf32>
    %7 = arith.maximumf %5, %6 : vector<8x128xf32>
    %8 = arith.truncf %7 : vector<8x128xf32> to vector<8x128xbf16>
    %c0_6 = arith.constant 0 : index
    %c0_7 = arith.constant 0 : index
    %9 = vector.load %arg4[%c0_6, %c0_7] : memref<128x128xbf16, #tpu.memory_space<vmem>>, vector<128x128xbf16>
    %cst_8 = arith.constant dense<0.000000e+00> : vector<8x128xf32>
    %10 = tpu.matmul %8, %9, %cst_8 {dimension_numbers = #tpu.dot_dimension_numbers<[1], [0], [0], [1], [0, 0, 1, 1], [], []>} : vector<8x128xbf16>, vector<128x128xbf16>, vector<8x128xf32> -> vector<8x128xf32>
    %c0_9 = arith.constant 0 : index
    %c0_10 = arith.constant 0 : index
    %11 = vector.load %arg5[%c0_9, %c0_10] : memref<1x128xf32, #tpu.memory_space<vmem>>, vector<1x128xf32>
    %12 = vector.broadcast %11 : vector<1x128xf32> to vector<8x128xf32>
    %13 = arith.addf %10, %12 : vector<8x128xf32>
    %cst_11 = arith.constant 0.000000e+00 : f32
    %14 = vector.broadcast %cst_11 : f32 to vector<8x128xf32>
    %15 = arith.maximumf %13, %14 : vector<8x128xf32>
    %16 = arith.truncf %15 : vector<8x128xf32> to vector<8x128xbf16>
    %c0_12 = arith.constant 0 : index
    %c0_13 = arith.constant 0 : index
    %17 = vector.load %arg6[%c0_12, %c0_13] : memref<128x2xbf16, #tpu.memory_space<vmem>>, vector<128x2xbf16>
    %cst_14 = arith.constant dense<0.000000e+00> : vector<8x2xf32>
    %18 = tpu.matmul %16, %17, %cst_14 {dimension_numbers = #tpu.dot_dimension_numbers<[1], [0], [0], [1], [0, 0, 1, 1], [], []>} : vector<8x128xbf16>, vector<128x2xbf16>, vector<8x2xf32> -> vector<8x2xf32>
    %c0_15 = arith.constant 0 : index
    %c0_16 = arith.constant 0 : index
    %19 = vector.load %arg7[%c0_15, %c0_16] : memref<1x2xf32, #tpu.memory_space<vmem>>, vector<1x2xf32>
    %20 = vector.broadcast %19 : vector<1x2xf32> to vector<8x2xf32>
    %21 = arith.addf %18, %20 : vector<8x2xf32>
    %c0_17 = arith.constant 0 : index
    %c0_18 = arith.constant 0 : index
    %22 = vector.load %arg8[%c0_17, %c0_18] : memref<8x2xf32, #tpu.memory_space<vmem>>, vector<8x2xf32>
    tpu.vector_store %arg8[%c0_17, %c0_18], %21 {strides = array<i32>} : memref<8x2xf32, #tpu.memory_space<vmem>>, vector<8x2xf32>,
    return
  }
  func.func @transform_0(%arg0: i32) -> (i32, i32) {
    %c0_i32 = arith.constant 0 : i32
    %c0_i32_0 = arith.constant 0 : i32
    return %arg0, %c0_i32 : i32, i32
  }
  func.func @transform_1(%arg0: i32) -> (i32, i32) {
    %c0_i32 = arith.constant 0 : i32
    %c0_i32_0 = arith.constant 0 : i32
    %c0_i32_1 = arith.constant 0 : i32
    return %c0_i32, %c0_i32_0 : i32, i32
  }
  func.func @transform_2(%arg0: i32) -> (i32, i32) {
    %c0_i32 = arith.constant 0 : i32
    %c0_i32_0 = arith.constant 0 : i32
    %c0_i32_1 = arith.constant 0 : i32
    return %c0_i32, %c0_i32_0 : i32, i32
  }
  func.func @transform_3(%arg0: i32) -> (i32, i32) {
    %c0_i32 = arith.constant 0 : i32
    %c0_i32_0 = arith.constant 0 : i32
    %c0_i32_1 = arith.constant 0 : i32
    return %c0_i32, %c0_i32_0 : i32, i32
  }
  func.func @transform_4(%arg0: i32) -> (i32, i32) {
    %c0_i32 = arith.constant 0 : i32
    %c0_i32_0 = arith.constant 0 : i32
    %c0_i32_1 = arith.constant 0 : i32
    return %c0_i32, %c0_i32_0 : i32, i32
  }
  func.func @transform_5(%arg0: i32) -> (i32, i32) {
    %c0_i32 = arith.constant 0 : i32
    %c0_i32_0 = arith.constant 0 : i32
    %c0_i32_1 = arith.constant 0 : i32
    return %c0_i32, %c0_i32_0 : i32, i32
  }
  func.func @transform_6(%arg0: i32) -> (i32, i32) {
    %c0_i32 = arith.constant 0 : i32
    %c0_i32_0 = arith.constant 0 : i32
    %c0_i32_1 = arith.constant 0 : i32
    return %c0_i32, %c0_i32_0 : i32, i32
  }
  func.func @transform_7(%arg0: i32) -> (i32, i32) {
    %c0_i32 = arith.constant 0 : i32
    %c0_i32_0 = arith.constant 0 : i32
    return %arg0, %c0_i32 : i32, i32
  }
}

</mosaic_0001>

<bundles_post_ra>
// kernel: tpu_custom_call.1
= control target key start
LH: loop header
LB: loop body
LE: loop exit
PB: predicated region body
PF: predicated region fallthrough
CT: control target
= control target key end

     0   :  { %12 = vsyncpa [#allocation3], 0  ;;  %s478_s24 = smov [#allocation2]   ;;  %s613_s0 = inlined_call_operand.vmem [shape: bf16[8,32], index: 0, kind: input, shape index: {}]   ;;  %s614_s1 = inlined_call_operand.hbm [shape: bf16[32,128], index: 1, kind: input, shape index: {}]   ;;  %s615_s2 = inlined_call_operand.vmem [shape: f32[1,128], index: 2, kind: input, shape index: {}]   ;;  %s616_s3 = inlined_call_operand.vmem [shape: bf16[128,128], index: 3, kind: input, shape index: {}]   ;;  %s617_s4 = inlined_call_operand.vmem [shape: f32[1,128], index: 4, kind: input, shape index: {}]   ;;  %s618_s5 = inlined_call_operand.vmem [shape: bf16[128,2], index: 5, kind: input, shape index: {}]   ;;  %s619_s6 = inlined_call_operand.vmem [shape: f32[1,2], index: 6, kind: input, shape index: {}]   ;;  %s620_s7 = inlined_call_operand.vmem [shape: f32[8,2], index: 7, kind: output, shape index: {}]  }
   0x1   :  { %s20_s25 = sshll.u32 %s478_s24, 4  ;;  %s21_s25 = int_to_ptr.vmem [resolvable:$true] %s20_s25 }
   0x2   :  { %s464_s26 = scalar_lea.vmem %s21_s25, 256  ;;  %p469_p1 = scmp.lt.s32.totalorder %s21_s25, %s21_s25 }
   0x3   :  { %p465_p0 = scmp.ne.s32.totalorder %s21_s25, %s464_s26  ;;  %p470_p2 = scmp.lt.s32.totalorder %s464_s26, %s464_s26 }
   0x5   :  { %p471_p3 = por %p470_p2, %p469_p1 }
   0x7   :  { %p472_p4 = pnand %p471_p3, %p465_p0 }
   0x9   :  { %475 = shalt.err (!%p472_p4)
}
   0xa   :  { %s479_s27 = smov 64   ;;  %s480_s28 = smov 4  }
   0xb   :  { %26 = dma.hbm_to_vmem [thread:$0]  %s614_s1, 256, %s21_s25, [#allocation3], %s479_s27, %s479_s27, %s480_s28  }
   0xc   :  { %476 = dma.done.wait [#allocation3], 256  }
   0xd   :  { %477 = vsyncadd [#allocation3], 4294967040  ;;  %v481_v0 = vmov 0.0   ;;  %vm482_vm0 = vmmov 0   ;;  %v438_v1 = vld [vmem:[#allocation2 + $0x8] sm:$0xff]   ;;  %v439_v2 = vld [vmem:[#allocation2] sm:$0xff]  }
   0xe   :  { %385 = vmatprep.subr.bf16.mxu0 %v481_v0  ;;  %389 = vmatprep.mubr.msk.bf16.mxu0 %vm482_vm0, %v481_v0  ;;  %v440_v3 = vld [vmem:[%s616_s3 + $0x38] sm:$0xff]   ;;  %vm65_vm1 = vcmask 261120   ;;  %v441_v4 = vld [vmem:[%s616_s3 + $0x30] sm:$0xff]   ;;  %v41_v5 = vld [vmem:[%s613_s0] sm:$0xf]  ;;  %vm335_vm2 = vcmask 15360  }
   0xf   :  { %393 = vmatprep.subr.bf16.mxu1 %v481_v0  ;;  %409 = vmatprep.mubr.msk.bf16.mxu1 %vm482_vm0, %v481_v0  ;;  %v442_v6 = vld [vmem:[%s616_s3 + $0x28] sm:$0xff]   ;;  %v443_v7 = vld [vmem:[%s616_s3 + $0x20] sm:$0xff]   ;;  %v444_v8 = vld [vmem:[%s616_s3 + $0x18] sm:$0xff]  }
  0x10   :  { %386 = vmatpush3.bf16.msra.mxu0 %v438_v1  ;;  %394 = vmatpush3.bf16.msra.mxu1 %v440_v3  ;;  %v445_v9 = vld [vmem:[%s616_s3 + $0x10] sm:$0xff]   ;;  %v446_v10 = vld [vmem:[%s616_s3 + $0x8] sm:$0xff]   ;;  %v447_v11 = vld [vmem:[%s616_s3] sm:$0xff]  }
  0x11   :  { %387 = vmatprep.subr.bf16.mxu0 %v481_v0  ;;  %395 = vmatprep.subr.bf16.mxu1 %v481_v0  ;;  %v448_v12 = vld [vmem:[%s618_s5 + $0x38] sm:$0xff]   ;;  %v449_v13 = vld [vmem:[%s618_s5 + $0x30] sm:$0xff]   ;;  %v450_v14 = vld [vmem:[%s618_s5 + $0x28] sm:$0xff]  }
  0x12   :  { %v451_v15 = vld [vmem:[%s618_s5 + $0x20] sm:$0xff]   ;;  %v452_v16 = vld [vmem:[%s618_s5 + $0x18] sm:$0xff]   ;;  %v453_v17 = vld [vmem:[%s618_s5 + $0x10] sm:$0xff]  }
  0x13   :  { %v342_v18 = vld [vmem:[%s615_s2] ss:$0 sm:$0xff]  ;;  %v454_v26 = vld [vmem:[%s618_s5 + $0x8] sm:$0xff]  }
  0x14   :  { %388 = vmatpush3.bf16.msra.mxu0 %v439_v2  ;;  %396 = vmatpush3.bf16.msra.mxu1 %v441_v4  ;;  %v455_v27 = vld [vmem:[%s618_s5] sm:$0xff]  }
  0x15   :  { %413 = vmatprep.subr.bf16.mxu0 %v481_v0  ;;  %397 = vmatprep.subr.bf16.mxu1 %v481_v0  ;;  %v346_v28 = vld [vmem:[%s617_s4] ss:$0 sm:$0xff] }
  0x16   :  { %v355_v36 = vld [vmem:[%s619_s6] ss:$0 sm:$0xff] }
  0x17   :  { %390 = vmatmul.mubr.msk.bf16.vlgmr.msra.gmra.mxu0 %vm65_vm1, %v41_v5 }
  0x18   :  { %429 = vmatprep.mubr.msk.bf16.mxu0 %vm482_vm0, %v481_v0  ;;  %398 = vmatpush3.bf16.msra.mxu1 %v442_v6 }
  0x19   :  { %399 = vmatprep.subr.bf16.mxu1 %v481_v0  ;;  %414 = vmatpush3.bf16.msra.mxu0 %v448_v12 }
  0x1a   :  { %415 = vmatprep.subr.bf16.mxu0 %v481_v0 }
  0x1c   :  { %400 = vmatpush3.bf16.msra.mxu1 %v443_v7 }
  0x1d   :  { %401 = vmatprep.subr.bf16.mxu1 %v481_v0  ;;  %416 = vmatpush3.bf16.msra.mxu0 %v449_v13 }
  0x1e   :  { %417 = vmatprep.subr.bf16.mxu0 %v481_v0 }
  0x20   :  { %402 = vmatpush3.bf16.msra.mxu1 %v444_v8 }
  0x21   :  { %403 = vmatprep.subr.bf16.mxu1 %v481_v0  ;;  %418 = vmatpush3.bf16.msra.mxu0 %v450_v14 }
  0x22   :  { %419 = vmatprep.subr.bf16.mxu0 %v481_v0 }
  0x24   :  { %404 = vmatpush3.bf16.msra.mxu1 %v445_v9 }
  0x25   :  { %405 = vmatprep.subr.bf16.mxu1 %v481_v0  ;;  %420 = vmatpush3.bf16.msra.mxu0 %v451_v15 }
  0x26   :  { %421 = vmatprep.subr.bf16.mxu0 %v481_v0 }
  0x28   :  { %406 = vmatpush3.bf16.msra.mxu1 %v446_v10 }
  0x29   :  { %407 = vmatprep.subr.bf16.mxu1 %v481_v0  ;;  %422 = vmatpush3.bf16.msra.mxu0 %v452_v16 }
  0x2a   :  { %423 = vmatprep.subr.bf16.mxu0 %v481_v0 }
  0x2c   :  { %408 = vmatpush3.bf16.msra.mxu1 %v447_v11 }
  0x2d   :  { %424 = vmatpush3.bf16.msra.mxu0 %v453_v17 }
  0x2e   :  { %425 = vmatprep.subr.bf16.mxu0 %v481_v0 }
  0x31   :  { %426 = vmatpush3.bf16.msra.mxu0 %v454_v26 }
  0x32   :  { %427 = vmatprep.subr.bf16.mxu0 %v481_v0 }
  0x35   :  { %428 = vmatpush3.bf16.msra.mxu0 %v455_v27 }
  0xd7   :  { %v103_v19 = vpop.f32.mrf.mxu0 }
  0xd8   :  { %v104_v20 = vadd.f32 %v342_v18, %v103_v19 }
  0xd9   :  { %v391_v21 = vpop.f32.mrf.mxu0 }
  0xda   :  { %v109_v22 = vmax.f32 %v104_v20, 0.0 }
  0xdb   :  { %v106_v23 = vpop.f32.mrf.mxu0 }
  0xdc   :  { %v110_v24 = vpack.c.bf16 %v109_v22, %v109_v22 }
  0xdd   :  { %v392_v25 = vpop.f32.mrf.mxu0 }
  0xde   :  { %410 = vmatmul.mubr.bf16.vlgmr.msra.gmra.mxu1 %v110_v24 }
 0x19e   :  { %v216_v29 = vpop.f32.mrf.mxu1 }
 0x19f   :  { %v217_v30 = vadd.f32 %v346_v28, %v216_v29 }
 0x1a0   :  { %v411_v31 = vpop.f32.mrf.mxu1 }
 0x1a1   :  { %v222_v32 = vmax.f32 %v217_v30, 0.0 }
 0x1a2   :  { %v219_v33 = vpop.f32.mrf.mxu1 }
 0x1a3   :  { %v223_v34 = vpack.c.bf16 %v222_v32, %v222_v32 }
 0x1a4   :  { %v412_v35 = vpop.f32.mrf.mxu1 }
 0x1a5   :  { %430 = vmatmul.mubr.bf16.vlgmr.msra.gmra.mxu0 %v223_v34 }
 0x265   :  { %v329_v37 = vpop.f32.mrf.mxu0 }
 0x266   :  { %v330_v38 = vadd.f32 %v355_v36, %v329_v37 }
 0x267   :  { %v431_v39 = vpop.f32.mrf.mxu0 }
 0x268   :  { %336 = vst.msk [vmem:[%s620_s7] sm:$0xff] %vm335_vm2, %v330_v38 }
 0x269   :  { %v332_v40 = vpop.f32.mrf.mxu0 }
 0x26b   :  { %v432_v41 = vpop.f32.mrf.mxu0 }
 0x26c   :  { %341 = vsyncpa [#allocation3], 1 }

// kernel: tpu_custom_call.1
= control target key start
LH: loop header
LB: loop body
LE: loop exit
PB: predicated region body
PF: predicated region fallthrough
CT: control target
= control target key end

     0   :  { %12 = vsyncpa [#allocation3], 0  ;;  %s478_s24 = smov [#allocation2]   ;;  %s613_s0 = inlined_call_operand.vmem [shape: bf16[8,32], index: 0, kind: input, shape index: {}]   ;;  %s614_s1 = inlined_call_operand.hbm [shape: bf16[32,128], index: 1, kind: input, shape index: {}]   ;;  %s615_s2 = inlined_call_operand.vmem [shape: f32[1,128], index: 2, kind: input, shape index: {}]   ;;  %s616_s3 = inlined_call_operand.vmem [shape: bf16[128,128], index: 3, kind: input, shape index: {}]   ;;  %s617_s4 = inlined_call_operand.vmem [shape: f32[1,128], index: 4, kind: input, shape index: {}]   ;;  %s618_s5 = inlined_call_operand.vmem [shape: bf16[128,2], index: 5, kind: input, shape index: {}]   ;;  %s619_s6 = inlined_call_operand.vmem [shape: f32[1,2], index: 6, kind: input, shape index: {}]   ;;  %s620_s7 = inlined_call_operand.vmem [shape: f32[8,2], index: 7, kind: output, shape index: {}]  }
   0x1   :  { %s20_s25 = sshll.u32 %s478_s24, 4  ;;  %s21_s25 = int_to_ptr.vmem [resolvable:$true] %s20_s25 }
   0x2   :  { %s464_s26 = scalar_lea.vmem %s21_s25, 256  ;;  %p469_p1 = scmp.lt.s32.totalorder %s21_s25, %s21_s25 }
   0x3   :  { %p465_p0 = scmp.ne.s32.totalorder %s21_s25, %s464_s26  ;;  %p470_p2 = scmp.lt.s32.totalorder %s464_s26, %s464_s26 }
   0x5   :  { %p471_p3 = por %p470_p2, %p469_p1 }
   0x7   :  { %p472_p4 = pnand %p471_p3, %p465_p0 }
   0x9   :  { %475 = shalt.err (!%p472_p4)
}
   0xa   :  { %s479_s27 = smov 64   ;;  %s480_s28 = smov 4  }
   0xb   :  { %26 = dma.hbm_to_vmem [thread:$0]  %s614_s1, 256, %s21_s25, [#allocation3], %s479_s27, %s479_s27, %s480_s28  }
   0xc   :  { %476 = dma.done.wait [#allocation3], 256  }
   0xd   :  { %477 = vsyncadd [#allocation3], 4294967040  ;;  %v481_v0 = vmov 0.0   ;;  %vm482_vm0 = vmmov 0   ;;  %v438_v1 = vld [vmem:[#allocation2 + $0x8] sm:$0xff]   ;;  %v439_v2 = vld [vmem:[#allocation2] sm:$0xff]  }
   0xe   :  { %385 = vmatprep.subr.bf16.mxu0 %v481_v0  ;;  %389 = vmatprep.mubr.msk.bf16.mxu0 %vm482_vm0, %v481_v0  ;;  %v440_v3 = vld [vmem:[%s616_s3 + $0x38] sm:$0xff]   ;;  %vm65_vm1 = vcmask 261120   ;;  %v441_v4 = vld [vmem:[%s616_s3 + $0x30] sm:$0xff]   ;;  %v41_v5 = vld [vmem:[%s613_s0] sm:$0xf]  ;;  %vm335_vm2 = vcmask 15360  }
   0xf   :  { %393 = vmatprep.subr.bf16.mxu1 %v481_v0  ;;  %409 = vmatprep.mubr.msk.bf16.mxu1 %vm482_vm0, %v481_v0  ;;  %v442_v6 = vld [vmem:[%s616_s3 + $0x28] sm:$0xff]   ;;  %v443_v7 = vld [vmem:[%s616_s3 + $0x20] sm:$0xff]   ;;  %v444_v8 = vld [vmem:[%s616_s3 + $0x18] sm:$0xff]  }
  0x10   :  { %386 = vmatpush3.bf16.msra.mxu0 %v438_v1  ;;  %394 = vmatpush3.bf16.msra.mxu1 %v440_v3  ;;  %v445_v9 = vld [vmem:[%s616_s3 + $0x10] sm:$0xff]   ;;  %v446_v10 = vld [vmem:[%s616_s3 + $0x8] sm:$0xff]   ;;  %v447_v11 = vld [vmem:[%s616_s3] sm:$0xff]  }
  0x11   :  { %387 = vmatprep.subr.bf16.mxu0 %v481_v0  ;;  %395 = vmatprep.subr.bf16.mxu1 %v481_v0  ;;  %v448_v12 = vld [vmem:[%s618_s5 + $0x38] sm:$0xff]   ;;  %v449_v13 = vld [vmem:[%s618_s5 + $0x30] sm:$0xff]   ;;  %v450_v14 = vld [vmem:[%s618_s5 + $0x28] sm:$0xff]  }
  0x12   :  { %v451_v15 = vld [vmem:[%s618_s5 + $0x20] sm:$0xff]   ;;  %v452_v16 = vld [vmem:[%s618_s5 + $0x18] sm:$0xff]   ;;  %v453_v17 = vld [vmem:[%s618_s5 + $0x10] sm:$0xff]  }
  0x13   :  { %v342_v18 = vld [vmem:[%s615_s2] ss:$0 sm:$0xff]  ;;  %v454_v26 = vld [vmem:[%s618_s5 + $0x8] sm:$0xff]  }
  0x14   :  { %388 = vmatpush3.bf16.msra.mxu0 %v439_v2  ;;  %396 = vmatpush3.bf16.msra.mxu1 %v441_v4  ;;  %v455_v27 = vld [vmem:[%s618_s5] sm:$0xff]  }
  0x15   :  { %413 = vmatprep.subr.bf16.mxu0 %v481_v0  ;;  %397 = vmatprep.subr.bf16.mxu1 %v481_v0  ;;  %v346_v28 = vld [vmem:[%s617_s4] ss:$0 sm:$0xff] }
  0x16   :  { %v355_v36 = vld [vmem:[%s619_s6] ss:$0 sm:$0xff] }
  0x17   :  { %390 = vmatmul.mubr.msk.bf16.vlgmr.msra.gmra.mxu0 %vm65_vm1, %v41_v5 }
  0x18   :  { %429 = vmatprep.mubr.msk.bf16.mxu0 %vm482_vm0, %v481_v0  ;;  %398 = vmatpush3.bf16.msra.mxu1 %v442_v6 }
  0x19   :  { %399 = vmatprep.subr.bf16.mxu1 %v481_v0  ;;  %414 = vmatpush3.bf16.msra.mxu0 %v448_v12 }
  0x1a   :  { %415 = vmatprep.subr.bf16.mxu0 %v481_v0 }
  0x1c   :  { %400 = vmatpush3.bf16.msra.mxu1 %v443_v7 }
  0x1d   :  { %401 = vmatprep.subr.bf16.mxu1 %v481_v0  ;;  %416 = vmatpush3.bf16.msra.mxu0 %v449_v13 }
  0x1e   :  { %417 = vmatprep.subr.bf16.mxu0 %v481_v0 }
  0x20   :  { %402 = vmatpush3.bf16.msra.mxu1 %v444_v8 }
  0x21   :  { %403 = vmatprep.subr.bf16.mxu1 %v481_v0  ;;  %418 = vmatpush3.bf16.msra.mxu0 %v450_v14 }
  0x22   :  { %419 = vmatprep.subr.bf16.mxu0 %v481_v0 }
  0x24   :  { %404 = vmatpush3.bf16.msra.mxu1 %v445_v9 }
  0x25   :  { %405 = vmatprep.subr.bf16.mxu1 %v481_v0  ;;  %420 = vmatpush3.bf16.msra.mxu0 %v451_v15 }
  0x26   :  { %421 = vmatprep.subr.bf16.mxu0 %v481_v0 }
  0x28   :  { %406 = vmatpush3.bf16.msra.mxu1 %v446_v10 }
  0x29   :  { %407 = vmatprep.subr.bf16.mxu1 %v481_v0  ;;  %422 = vmatpush3.bf16.msra.mxu0 %v452_v16 }
  0x2a   :  { %423 = vmatprep.subr.bf16.mxu0 %v481_v0 }
  0x2c   :  { %408 = vmatpush3.bf16.msra.mxu1 %v447_v11 }
  0x2d   :  { %424 = vmatpush3.bf16.msra.mxu0 %v453_v17 }
  0x2e   :  { %425 = vmatprep.subr.bf16.mxu0 %v481_v0 }
  0x31   :  { %426 = vmatpush3.bf16.msra.mxu0 %v454_v26 }
  0x32   :  { %427 = vmatprep.subr.bf16.mxu0 %v481_v0 }
  0x35   :  { %428 = vmatpush3.bf16.msra.mxu0 %v455_v27 }
  0xd7   :  { %v103_v19 = vpop.f32.mrf.mxu0 }
  0xd8   :  { %v104_v20 = vadd.f32 %v342_v18, %v103_v19 }
  0xd9   :  { %v391_v21 = vpop.f32.mrf.mxu0 }
  0xda   :  { %v109_v22 = vmax.f32 %v104_v20, 0.0 }
  0xdb   :  { %v106_v23 = vpop.f32.mrf.mxu0 }
  0xdc   :  { %v110_v24 = vpack.c.bf16 %v109_v22, %v109_v22 }
  0xdd   :  { %v392_v25 = vpop.f32.mrf.mxu0 }
  0xde   :  { %410 = vmatmul.mubr.bf16.vlgmr.msra.gmra.mxu1 %v110_v24 }
 0x19e   :  { %v216_v29 = vpop.f32.mrf.mxu1 }
 0x19f   :  { %v217_v30 = vadd.f32 %v346_v28, %v216_v29 }
 0x1a0   :  { %v411_v31 = vpop.f32.mrf.mxu1 }
 0x1a1   :  { %v222_v32 = vmax.f32 %v217_v30, 0.0 }
 0x1a2   :  { %v219_v33 = vpop.f32.mrf.mxu1 }
 0x1a3   :  { %v223_v34 = vpack.c.bf16 %v222_v32, %v222_v32 }
 0x1a4   :  { %v412_v35 = vpop.f32.mrf.mxu1 }
 0x1a5   :  { %430 = vmatmul.mubr.bf16.vlgmr.msra.gmra.mxu0 %v223_v34 }
 0x265   :  { %v329_v37 = vpop.f32.mrf.mxu0 }
 0x266   :  { %v330_v38 = vadd.f32 %v355_v36, %v329_v37 }
 0x267   :  { %v431_v39 = vpop.f32.mrf.mxu0 }
 0x268   :  { %336 = vst.msk [vmem:[%s620_s7] sm:$0xff] %vm335_vm2, %v330_v38 }
 0x269   :  { %v332_v40 = vpop.f32.mrf.mxu0 }
 0x26b   :  { %v432_v41 = vpop.f32.mrf.mxu0 }
 0x26c   :  { %341 = vsyncpa [#allocation3], 1 }

</bundles_post_ra>
